<compile_context>
chip_gen: v5e
topology: v5e:2x2
jax: 0.10.0
libtpu: 0.0.40
codegen_flags: <defaults>
</compile_context>

<pallas_src>
import functools

import jax
import jax.numpy as jnp
from jax.experimental import pallas as pl
from jax.experimental.pallas import tpu as pltpu

_LANES = 128      # vreg lane width
_SUBLANES = 8     # int32/f32 sublane count


def _padded_rows(batch: int) -> int:
    """Rows of a lane-dense (rows, 128) int32 slab covering `batch` actions."""
    rows = pl.cdiv(batch, _LANES)
    return max(_SUBLANES, pl.cdiv(rows, _SUBLANES) * _SUBLANES)


def _random_action_kernel(seed_ref, out_ref, *, n_actions: int):
    # forward() in the reference module raises NotImplementedError; act() is
    # the only compute path: one uniform draw in [0, n_actions) per element.
    rows, lanes = out_ref.shape

    seed = seed_ref[0].astype(jnp.uint32)

    # Flat element index (int32 iota is TPU-safe; bit-identical cast to u32).
    row = jax.lax.broadcasted_iota(jnp.int32, (rows, lanes), 0)
    col = jax.lax.broadcasted_iota(jnp.int32, (rows, lanes), 1)
    x = (row * lanes + col).astype(jnp.uint32)

    # splitmix32 / murmur3-finalizer style mix of (seed, index): pure VPU ops,
    # wraps mod 2**32.  Quality is far beyond what a random agent needs.
    x = x + seed * jnp.uint32(0x9E3779B9)
    x = x ^ (x >> jnp.uint32(16))
    x = x * jnp.uint32(0x7FEB352D)
    x = x ^ (x >> jnp.uint32(15))
    x = x * jnp.uint32(0x846CA68B)
    x = x ^ (x >> jnp.uint32(16))

    # Map the top 24 bits to [0, n_actions) with one f32 multiply + truncation
    # (values < 2**24 are exact in f32; no integer divide/mod needed).
    # TODO(synk): tiny rounding bias vs np.random.choice; negligible for the
    # small discrete action spaces this agent targets.
    u24 = (x >> jnp.uint32(8)).astype(jnp.float32)
    act = (u24 * jnp.float32(n_actions / 16777216.0)).astype(jnp.int32)
    out_ref[...] = jnp.minimum(act, jnp.int32(n_actions - 1))


def random_actions(state: jax.Array, seed: int, n_actions: int) -> jax.Array:
    """Returns int32 actions of shape [B], one uniform draw per batch row."""
    B = state.shape[0]
    rows = _padded_rows(B)
    seed_arr = jnp.asarray([seed], dtype=jnp.int32)

    # Note: `state` is intentionally NOT an input to pallas_call — the random
    # agent ignores the observation, so streaming it into VMEM is pure waste.
    out = pl.pallas_call(
        functools.partial(_random_action_kernel, n_actions=n_actions),
        out_shape=jax.ShapeDtypeStruct((rows, _LANES), jnp.int32),
        in_specs=[pl.BlockSpec(memory_space=pltpu.MemorySpace.SMEM)],
        out_specs=pl.BlockSpec(memory_space=pltpu.MemorySpace.VMEM),
    )(seed_arr)

    # Lane-dense slab -> contiguous flatten, take the first B actions.
    return out.reshape(-1)[:B]


class Actor:
    """JAX/Pallas port of the random-agent Actor (no parameters)."""

    def __init__(self, action_dim: int):
        self.n_actions = action_dim

    def forward(self, state: jax.Array) -> jax.Array:
        # Faithful to the reference module.
        raise NotImplementedError

    def act(self, state: jax.Array, seed: int = 0) -> jax.Array:
        # TODO(synk): the reference uses the global np.random state; callers
        # here must thread a fresh `seed` each step for non-repeating actions.
        return random_actions(state, seed, self.n_actions)


if __name__ == "__main__":
    key = jax.random.PRNGKey(0)
    B, obs_dim = 2, 32
    action_dim = 4

    state = jax.random.normal(key, (B, obs_dim), dtype=jnp.float32)

    actor = Actor(action_dim)
    actions = jax.block_until_ready(actor.act(state, seed=0))

    assert actions.shape == (B,)
    assert actions.dtype == jnp.int32
    assert bool(jnp.all(actions >= 0)) and bool(jnp.all(actions < action_dim))

    # Batches larger than 8 now work (previous version truncated to 8).
    big_state = jax.random.normal(key, (200, obs_dim), dtype=jnp.float32)
    big_actions = jax.block_until_ready(actor.act(big_state, seed=7))
    assert big_actions.shape == (200,)
    assert bool(jnp.all(big_actions >= 0)) and bool(jnp.all(big_actions < action_dim))

    print("KERNEL_OK")
</pallas_src>

<mosaic_0001>
module attributes {stable_mosaic.version = 11 : i64} {
  func.func @_random_action_kernel(%arg0: memref<1xi32, #tpu.memory_space<smem>>, %arg1: memref<8x128xi32, #tpu.memory_space<vmem>>) attributes {dimension_semantics = [], scalar_prefetch = 0 : i64, scratch_operands = 0 : i64, tpu.core_type = #tpu.core_type<tc>} {
    %c0 = arith.constant 0 : index
    %0 = memref.load %arg0[%c0] : memref<1xi32, #tpu.memory_space<smem>>
    %1 = tpu.iota {dimensions = array<i32: 0>} : vector<8x128xi32>
    %2 = tpu.iota {dimensions = array<i32: 1>} : vector<8x128xi32>
    %c128_i32 = arith.constant 128 : i32
    %3 = vector.broadcast %c128_i32 : i32 to vector<8x128xi32>
    %4 = arith.muli %1, %3 : vector<8x128xi32>
    %5 = arith.addi %4, %2 : vector<8x128xi32>
    %c-1640531527_i32 = arith.constant -1640531527 : i32
    %6 = arith.muli %0, %c-1640531527_i32 : i32
    %7 = vector.broadcast %6 : i32 to vector<8x128xi32>
    %8 = arith.addi %5, %7 : vector<8x128xi32>
    %c16_i32 = arith.constant 16 : i32
    %9 = vector.broadcast %c16_i32 : i32 to vector<8x128xi32>
    %10 = arith.shrui %8, %9 : vector<8x128xi32>
    %11 = arith.xori %8, %10 : vector<8x128xi32>
    %c2146121005_i32 = arith.constant 2146121005 : i32
    %12 = vector.broadcast %c2146121005_i32 : i32 to vector<8x128xi32>
    %13 = arith.muli %11, %12 : vector<8x128xi32>
    %c15_i32 = arith.constant 15 : i32
    %14 = vector.broadcast %c15_i32 : i32 to vector<8x128xi32>
    %15 = arith.shrui %13, %14 : vector<8x128xi32>
    %16 = arith.xori %13, %15 : vector<8x128xi32>
    %c-2073254261_i32 = arith.constant -2073254261 : i32
    %17 = vector.broadcast %c-2073254261_i32 : i32 to vector<8x128xi32>
    %18 = arith.muli %16, %17 : vector<8x128xi32>
    %c16_i32_0 = arith.constant 16 : i32
    %19 = vector.broadcast %c16_i32_0 : i32 to vector<8x128xi32>
    %20 = arith.shrui %18, %19 : vector<8x128xi32>
    %21 = arith.xori %18, %20 : vector<8x128xi32>
    %c8_i32 = arith.constant 8 : i32
    %22 = vector.broadcast %c8_i32 : i32 to vector<8x128xi32>
    %23 = arith.shrui %21, %22 : vector<8x128xi32>
    %24 = arith.uitofp %23 : vector<8x128xi32> to vector<8x128xf32>
    %cst = arith.constant 2.38418579E-7 : f32
    %25 = vector.broadcast %cst : f32 to vector<8x128xf32>
    %26 = arith.mulf %24, %25 : vector<8x128xf32>
    %27 = arith.fptosi %26 : vector<8x128xf32> to vector<8x128xi32>
    %c3_i32 = arith.constant 3 : i32
    %28 = vector.broadcast %c3_i32 : i32 to vector<8x128xi32>
    %29 = arith.minsi %27, %28 : vector<8x128xi32>
    %c0_1 = arith.constant 0 : index
    %c0_2 = arith.constant 0 : index
    %30 = vector.load %arg1[%c0_1, %c0_2] : memref<8x128xi32, #tpu.memory_space<vmem>>, vector<8x128xi32>
    tpu.vector_store %arg1[%c0_1, %c0_2], %29 {strides = array<i32>} : memref<8x128xi32, #tpu.memory_space<vmem>>, vector<8x128xi32>,
    return
  }
}

</mosaic_0001>

<bundles_post_ra>
// kernel: tpu_custom_call.1
= control target key start
LH: loop header
LB: loop body
LE: loop exit
PB: predicated region body
PF: predicated region fallthrough
CT: control target
= control target key end

     0   :  { %v11_v0 = vlaneseq  ;;  %s105_s0 = inlined_call_operand.<no memory space> [shape: s32[1], index: 0, kind: input, shape index: {}]   ;;  %s106_s1 = inlined_call_operand.hbm [shape: s32[8,128], index: 1, kind: output, shape index: {}]  }
   0x1   :  { %7 = vsyncpa [#allocation4], 0  ;;  %s17_s8 = smul.u32 2654435769, %s105_s0  ;;  %s88_s0 = smov [#allocation3]  }
   0x2   :  { %v12_v1 = vshrl.u32 %v11_v0, 7  ;;  %v14_v2 = vand.u32 127, %v11_v0  ;;  %s45_s9 = sshll.u32 %s88_s0, 4  ;;  %s47_s12 = sshll.u32 %s106_s1, 4  ;;  %s46_s9 = int_to_ptr.vmem [resolvable:$true] %s45_s9  ;;  %s48_s12 = int_to_ptr.hbm [resolvable:$true] %s47_s12 }
   0x3   :  { %v18_v4 = vstv %s17_s8 }
   0x4   :  { %v15_v3 = vmul.u32 128, %v12_v1 }
   0x6   :  { %v16_v5 = vadd.s32 %v15_v3, %v14_v2 }
   0x8   :  { %v19_v6 = vadd.s32 %v18_v4, %v16_v5 }
   0xa   :  { %v20_v7 = vshrl.u32 %v19_v6, 16 }
   0xc   :  { %v21_v8 = vxor.u32 %v20_v7, %v19_v6 }
   0xe   :  { %v22_v9 = vmul.u32 2146121005, %v21_v8 }
  0x10   :  { %v23_v10 = vshrl.u32 %v22_v9, 15 }
  0x12   :  { %v24_v11 = vxor.u32 %v23_v10, %v22_v9 }
  0x14   :  { %v25_v12 = vmul.u32 2221713035, %v24_v11 }
  0x16   :  { %v26_v13 = vshrl.u32 %v25_v12, 16 }
  0x18   :  { %v27_v14 = vxor.u32 %v26_v13, %v25_v12 }
  0x1a   :  { %v28_v15 = vshrl.u32 %v27_v14, 8 }
  0x1c   :  { %v29_v16 = vshrl.u32 %v28_v15, 16  ;;  %v30_v17 = vand.u32 65535, %v28_v15 }
  0x1e   :  { %v31_v18 = vcvt.s32.f32 %v29_v16  ;;  %v33_v19 = vcvt.s32.f32 %v30_v17 }
  0x20   :  { %v32_v20 = vmul.f32 65536.0, %v31_v18 }
  0x22   :  { %v34_v21 = vadd.f32 %v33_v19, %v32_v20 }
  0x24   :  { %v35_v22 = vmul.f32 2.3841858e-07, %v34_v21 }
  0x26   :  { %vm56_vm0 = vcmp.lt.s32.totalorder %v35_v22, 0  ;;  %v57_v23 = vceil.f32 %v35_v22  ;;  %v58_v24 = vfloor.f32 %v35_v22 }
  0x28   :  { %v59_v25 = vsel %vm56_vm0, %v57_v23, %v58_v24 }
  0x29   :  { %v60_v26 = vcvt.f32.s32 %v59_v25 }
  0x2b   :  { %vm37_vm1 = vcmp.lt.s32.totalorder %v60_v26, 3 }
  0x2c   :  { %v38_v27 = vsel %vm37_vm1, %v60_v26, 3 }
  0x2d   :  { %39 = vst [vmem:[#allocation3] sm:$0xff] %v38_v27 }
  0x2e   :  { %50 = dma.vmem_to_hbm [thread:$0]  %s46_s9, 128, %s48_s12, [#allocation4]  }
  0x2f   :  { %86 = dma.done.wait [#allocation4], 128  }
  0x30   :  { %87 = vsyncadd [#allocation4], 4294967168 }
  0x31   :  { %55 = vsyncpa [#allocation4], 1 }

</bundles_post_ra>
